<compile_context>
chip_gen: v7x
topology: tpu7x:2x2x1
jax: 0.10.0
libtpu: 0.0.40
codegen_flags: <defaults>
</compile_context>

<pallas_src>
import functools
import numpy as np
import jax
import jax.numpy as jnp
from jax import lax
from jax.experimental import pallas as pl
from jax.experimental.pallas import tpu as pltpu


# ----------------------------------------------------------------------------
# Parameter construction (mirrors PretrainedLoss.__init__ / get_hash_targets)
# ----------------------------------------------------------------------------
def _hadamard(n: int) -> np.ndarray:
    """Sylvester Hadamard matrix (n must be a power of 2)."""
    H = np.array([[1.0]], dtype=np.float64)
    while H.shape[0] < n:
        H = np.block([[H, H], [H, -H]])
    return H


def get_hash_targets(n_class: int, bits: int) -> np.ndarray:
    H_K = _hadamard(bits)
    H_2K = np.concatenate((H_K, -H_K), 0)
    assert H_2K.shape[0] >= n_class, "small-shape demo stays on the Hadamard branch"
    # TODO(synk): the random re-sampling branch (H_2K rows < n_class) is
    # data-dependent host-side init logic, not kernel compute; omitted here.
    return H_2K[:n_class].astype(np.float32)


# ----------------------------------------------------------------------------
# Fast kernel: only the term the module actually returns (theta * BCE).
# Pure VPU + one EUP log per element; single cross-lane reduction for the mean.
# ----------------------------------------------------------------------------
def _loss2_kernel(code_ref, h_ref, out_ref, *, theta):
    code = code_ref[...].astype(jnp.float32)     # (n, bits)
    h = h_ref[...].astype(jnp.float32)           # (n, bits), exactly +-1
    p = 0.5 * (code + 1.0)
    # t = 0.5*(h+1) in {0,1}  ->  single log per element instead of two.
    q = jnp.where(h > 0.0, p, 1.0 - p)
    logq = jnp.maximum(jnp.log(q), -100.0)       # PyTorch BCE clamps log at -100
    inv_count = 1.0 / float(code.shape[0] * code.shape[1])
    out_ref[0] = theta * (-(jnp.sum(logq) * inv_count))


# ----------------------------------------------------------------------------
# Full kernel (optional): also materializes loss1 / loss3 / re like the torch
# forward does before discarding them.  a @ a.T is expressed via dot_general
# contracting on the last dims, so no explicit transpose / relayout is needed.
# ----------------------------------------------------------------------------
def _full_kernel(x_ref, code_ref, h_ref, out_ref, *, bits, theta):
    x = x_ref[...].astype(jnp.float32)           # (n, feat)
    code = code_ref[...].astype(jnp.float32)     # (n, bits)
    h = h_ref[...].astype(jnp.float32)           # (n, bits)
    n = code.shape[0]

    dn = (((1,), (1,)), ((), ()))                # a @ a.T, transpose folded into MXU feed

    # ---- loss1: relu(code code^T - bits*I) ** 2, summed / n^2 ----
    cc = lax.dot_general(code, code, dimension_numbers=dn,
                         preferred_element_type=jnp.float32)          # (n, n)
    row = lax.broadcasted_iota(jnp.int32, (n, n), 0)
    col = lax.broadcasted_iota(jnp.int32, (n, n), 1)
    eye = (row == col).astype(jnp.float32)
    l1 = jnp.maximum(cc - float(bits) * eye, 0.0)
    loss1 = jnp.sum(l1 * l1) / float(n * n)

    # ---- loss2: BCE with +-1 targets (single-log form, exact) ----
    p = 0.5 * (code + 1.0)
    q = jnp.where(h > 0.0, p, 1.0 - p)
    loss2 = -jnp.mean(jnp.maximum(jnp.log(q), -100.0))

    # ---- re: quantization residual (computed then discarded in torch forward) ----
    re = jnp.sum((jnp.sign(code) - code) ** 2) / float(n)

    # ---- loss3: MSE(L@S, S@L) with row softmaxes of the two covariances ----
    def _softmax_rows(u):
        m = jnp.max(u, axis=1, keepdims=True)
        e = jnp.exp(u - m)
        return e * pl.reciprocal(jnp.sum(e, axis=1, keepdims=True), approx=True)

    u_L = lax.dot_general(x, x, dimension_numbers=dn,
                          preferred_element_type=jnp.float32)          # (n, n)
    L_ij = _softmax_rows(u_L)
    S_ij = _softmax_rows(cc)
    AB = jnp.dot(L_ij, S_ij, preferred_element_type=jnp.float32)
    BA = jnp.dot(S_ij, L_ij, preferred_element_type=jnp.float32)
    loss3 = jnp.mean((AB - BA) ** 2)

    # ---- module return value is theta * loss2; the rest is aux only ----
    out_ref[0] = theta * loss2
    out_ref[1] = loss1
    out_ref[2] = loss3
    out_ref[3] = re


def pretrained_loss(x_L, code, hash_targets, *, bits, theta=1.0, compute_aux=False):
    """Returns (loss, out_vec). loss == theta * BCE term (the module's return value).

    compute_aux=False (default): loss2-only kernel, x_L is not even DMA'd.
    compute_aux=True: also computes loss1 / loss3 / re (like the torch forward).
    """
    vmem = pl.BlockSpec(memory_space=pltpu.MemorySpace.VMEM)
    smem = pl.BlockSpec(memory_space=pltpu.MemorySpace.SMEM)

    if not compute_aux:
        out = pl.pallas_call(
            functools.partial(_loss2_kernel, theta=theta),
            out_shape=jax.ShapeDtypeStruct((1,), jnp.float32),
            in_specs=[vmem, vmem],          # code, hash_targets (x_L not needed)
            out_specs=smem,
        )(code, hash_targets)
        return out[0], out

    out = pl.pallas_call(
        functools.partial(_full_kernel, bits=bits, theta=theta),
        out_shape=jax.ShapeDtypeStruct((4,), jnp.float32),
        in_specs=[vmem, vmem, vmem],        # x_L, code, hash_targets
        out_specs=smem,
    )(x_L, code, hash_targets)
    return out[0], out


# ----------------------------------------------------------------------------
# Pure-JAX reference (PyTorch-style two-log BCE) for correctness checking
# ----------------------------------------------------------------------------
def _reference_loss(x_L, code, hash_targets, bits, theta=1.0):
    p = 0.5 * (code + 1.0)
    t = 0.5 * (hash_targets + 1.0)
    log_p = jnp.maximum(jnp.log(p), -100.0)
    log_1mp = jnp.maximum(jnp.log(1.0 - p), -100.0)
    loss2 = -jnp.mean(t * log_p + (1.0 - t) * log_1mp)
    return theta * loss2


if __name__ == "__main__":
    # Small shapes consistent with the module's math:
    #   code, hash_targets : (n_class, bits); x_L : (n_class, feat)
    n_class, bits, feat = 8, 16, 32

    key = jax.random.PRNGKey(0)
    k1, k2 = jax.random.split(key)
    x_L = jax.random.normal(k1, (n_class, feat), dtype=jnp.float32)
    # code is a hash code in (-1, 1) (tanh-like output), keeping BCE inputs valid.
    code = jnp.tanh(jax.random.normal(k2, (n_class, bits), dtype=jnp.float32))
    hash_targets = jnp.asarray(get_hash_targets(n_class, bits))

    ref = _reference_loss(x_L, code, hash_targets, bits)

    # Default fast path (what the module returns).
    loss_fast, _ = pretrained_loss(x_L, code, hash_targets, bits=bits, theta=1.0)
    loss_fast = jax.block_until_ready(loss_fast)
    assert np.allclose(np.asarray(loss_fast), np.asarray(ref), rtol=1e-5, atol=1e-5), (
        float(loss_fast), float(ref))

    # Optional aux path (full torch-forward replica) — returned loss must match too.
    loss_full, aux = pretrained_loss(x_L, code, hash_targets, bits=bits, theta=1.0,
                                     compute_aux=True)
    loss_full = jax.block_until_ready(loss_full)
    assert np.allclose(np.asarray(loss_full), np.asarray(ref), rtol=1e-5, atol=1e-5), (
        float(loss_full), float(ref))

    print("KERNEL_OK")
</pallas_src>

<mosaic_0001>
module attributes {stable_mosaic.version = 11 : i64} {
  func.func @_loss2_kernel(%arg0: memref<8x16xf32, #tpu.memory_space<vmem>>, %arg1: memref<8x16xf32, #tpu.memory_space<vmem>>, %arg2: memref<1xf32, #tpu.memory_space<smem>>) attributes {dimension_semantics = [], scalar_prefetch = 0 : i64, scratch_operands = 0 : i64, tpu.core_type = #tpu.core_type<tc>} {
    %c0 = arith.constant 0 : index
    %c0_0 = arith.constant 0 : index
    %0 = vector.load %arg0[%c0, %c0_0] : memref<8x16xf32, #tpu.memory_space<vmem>>, vector<8x16xf32>
    %c0_1 = arith.constant 0 : index
    %c0_2 = arith.constant 0 : index
    %1 = vector.load %arg1[%c0_1, %c0_2] : memref<8x16xf32, #tpu.memory_space<vmem>>, vector<8x16xf32>
    %cst = arith.constant 1.000000e+00 : f32
    %2 = vector.broadcast %cst : f32 to vector<8x16xf32>
    %3 = arith.addf %0, %2 : vector<8x16xf32>
    %cst_3 = arith.constant 5.000000e-01 : f32
    %4 = vector.broadcast %cst_3 : f32 to vector<8x16xf32>
    %5 = arith.mulf %4, %3 : vector<8x16xf32>
    %cst_4 = arith.constant 0.000000e+00 : f32
    %6 = vector.broadcast %cst_4 : f32 to vector<8x16xf32>
    %7 = arith.cmpf ogt, %1, %6 : vector<8x16xf32>
    %cst_5 = arith.constant 1.000000e+00 : f32
    %8 = vector.broadcast %cst_5 : f32 to vector<8x16xf32>
    %9 = arith.subf %8, %5 : vector<8x16xf32>
    %10 = arith.select %7, %5, %9 : vector<8x16xi1>, vector<8x16xf32>
    %11 = math.log %10 : vector<8x16xf32>
    %cst_6 = arith.constant -1.000000e+02 : f32
    %12 = vector.broadcast %cst_6 : f32 to vector<8x16xf32>
    %13 = arith.maximumf %11, %12 : vector<8x16xf32>
    %14 = vector.shape_cast %13 : vector<8x16xf32> to vector<1x8x16xf32>
    %cst_7 = arith.constant dense<0.000000e+00> : vector<1xf32>
    %15 = vector.multi_reduction <add>, %14, %cst_7 [1, 2] : vector<1x8x16xf32> to vector<1xf32>
    %16 = vector.shape_cast %15 : vector<1xf32> to vector<1x1x1xf32>
    %17 = vector.extract %16[0, 0, 0] : f32 from vector<1x1x1xf32>
    %cst_8 = arith.constant 7.812500e-03 : f32
    %18 = arith.mulf %17, %cst_8 : f32
    %cst_9 = arith.constant 0.000000e+00 : f32
    %19 = arith.subf %cst_9, %18 : f32
    %cst_10 = arith.constant 1.000000e+00 : f32
    %20 = arith.mulf %cst_10, %19 : f32
    %c0_11 = arith.constant 0 : index
    %21 = memref.load %arg2[%c0_11] : memref<1xf32, #tpu.memory_space<smem>>
    memref.store %20, %arg2[%c0_11] : memref<1xf32, #tpu.memory_space<smem>>
    return
  }
}

</mosaic_0001>

<bundles_post_ra>
// kernel: tpu_custom_call.1
= control target key start
LH: loop header
LB: loop body
LE: loop exit
PB: predicated region body
PF: predicated region fallthrough
CT: control target
= control target key end

     0   :  { %7 = vsyncpa [#allocation3], 0  ;;  %s197_s0 = inlined_call_operand.hbm [shape: f32[8,16], index: 0, kind: input, shape index: {}]   ;;  %s198_s1 = inlined_call_operand.hbm [shape: f32[8,16], index: 1, kind: input, shape index: {}]   ;;  %s199_s2 = inlined_call_operand.hbm [shape: f32[1], index: 2, kind: output, shape index: {}]  }
   0x1   :  { %8 = vsyncpa [#allocation6], 0 }
   0x2   :  { %9 = vsyncpa [#allocation4], 0  ;;  %s143_s9 = smov [#allocation2]   ;;  %s144_s11 = smov [#allocation5]  }
   0x3   :  { %s16_s10 = sshll.u32 %s143_s9, 4  ;;  %s26_s12 = sshll.u32 %s144_s11, 4  ;;  %s17_s10 = int_to_ptr.vmem [resolvable:$true] %s16_s10  ;;  %s27_s12 = int_to_ptr.vmem [resolvable:$true] %s26_s12 }
   0x4   :  { %s83_s15 = scalar_lea.hbm %s197_s0, 128 }
   0x5   :  { %p84_p0 = scmp.ne.s32.totalorder %s197_s0, %s83_s15  ;;  %p87_p1 = scmp.lt.u32.totalorder %s83_s15, %s197_s0 }
   0x7   :  { %p89_p2 = pnand %p87_p1, %p84_p0 }
   0x9   :  { %92 = shalt.err (!%p89_p2)
}
   0xa   :  { %s93_s20 = scalar_lea.vmem %s17_s10, 128  ;;  %p98_p4 = scmp.lt.s32.totalorder %s17_s10, %s17_s10 }
   0xb   :  { %p94_p3 = scmp.ne.s32.totalorder %s17_s10, %s93_s20  ;;  %p99_p5 = scmp.lt.s32.totalorder %s93_s20, %s93_s20 }
   0xd   :  { %p100_p6 = por %p99_p5, %p98_p4 }
   0xf   :  { %p101_p7 = pnand %p100_p6, %p94_p3 }
  0x11   :  { %104 = shalt.err (!%p101_p7)
}
  0x12   :  { %19 = dma.hbm_to_vmem [thread:$0]  %s197_s0, 128, %s17_s10, [#allocation3]  }
  0x13   :  { %s105_s25 = scalar_lea.hbm %s198_s1, 128 }
  0x14   :  { %p106_p8 = scmp.ne.s32.totalorder %s198_s1, %s105_s25  ;;  %p109_p9 = scmp.lt.u32.totalorder %s105_s25, %s198_s1 }
  0x16   :  { %p111_p10 = pnand %p109_p9, %p106_p8 }
  0x18   :  { %114 = shalt.err (!%p111_p10)
}
  0x19   :  { %s115_s30 = scalar_lea.vmem %s27_s12, 128  ;;  %p120_p12 = scmp.lt.s32.totalorder %s27_s12, %s27_s12 }
  0x1a   :  { %p116_p11 = scmp.ne.s32.totalorder %s27_s12, %s115_s30  ;;  %p121_p13 = scmp.lt.s32.totalorder %s115_s30, %s115_s30 }
  0x1c   :  { %p122_p0 = por %p121_p13, %p120_p12 }
  0x1e   :  { %p123_p1 = pnand %p122_p0, %p116_p11 }
  0x20   :  { %126 = shalt.err (!%p123_p1)
}
  0x21   :  { %29 = dma.hbm_to_vmem [thread:$0]  %s198_s1, 128, %s27_s12, [#allocation6]  }
  0x22   :  { %137 = dma.done.wait [#allocation3], 128  }
  0x23   :  { %138 = vsyncadd [#allocation3], 4294967168 }
  0x24   :  { %139 = dma.done.wait [#allocation6], 128  }
  0x25   :  { %140 = vsyncadd [#allocation6], 4294967168  ;;  %v36_v0 = vld [vmem:[#allocation2] sm:$0xff]  ;;  %v37_v1 = vld [vmem:[#allocation5] sm:$0xff]  ;;  %vm46_vm1 = vcmask 130048   ;;  %s127_s8 = scalar_lea.hbm %s199_s2, 16 }
  0x26   :  { %v38_v2 = vadd.f32 1.0, %v36_v0  ;;  %vm40_vm0 = vcmp.gt.f32.partialorder %v37_v1, 0.0  ;;  %p128_p2 = scmp.ne.s32.totalorder %s199_s2, %s127_s8  ;;  %p131_p3 = scmp.lt.u32.totalorder %s127_s8, %s199_s2 }
  0x28   :  { %v39_v3 = vmul.f32 0.5, %v38_v2  ;;  %p133_p4 = pnand %p131_p3, %p128_p2 }
  0x2a   :  { %v41_v4 = vsub.f32 1.0, %v39_v3 }
  0x2c   :  { %v42_v5 = vsel %vm40_vm0, %v39_v3, %v41_v4 }
  0x2d   :  { %81 = vlog2.f32 %v42_v5 }
  0x37   :  { %v82_v6 = vpop.eup %81 }
  0x38   :  { %v44_v7 = vmul.f32 0.6931472, %v82_v6 }
  0x3a   :  { %v45_v8 = vmax.f32 %v44_v7, -100.0 }
  0x3c   :  { %v47_v9 = vsel %vm46_vm1, %v45_v8, 0.0 }
  0x3d   :  { %48 = vadd.xlane.f32.xlu0 %v47_v9 }
  0xca   :  { %v49_v10 = vpop.xlane.xlu0 %48 }
  0xcb   :  { %v50_v11 = vrot.slane %v49_v10, 4 }
  0xcd   :  { %v51_v12 = vadd.f32 %v50_v11, %v49_v10 }
  0xcf   :  { %v52_v13 = vrot.slane %v51_v12, 2 }
  0xd1   :  { %v53_v14 = vadd.f32 %v52_v13, %v51_v12 }
  0xd3   :  { %v54_v15 = vrot.slane %v53_v14, 1 }
  0xd5   :  { %v55_v16 = vadd.f32 %v54_v15, %v53_v14 }
  0xd7   :  { %76 = vpush %v55_v16 }
 0x108   :  { %s77_s1 = spop %76 }
 0x109   :  { %s57_s4 = smul.f32 0.0078125, %s77_s1 }
 0x10b   :  { %s58_s5 = ssub.f32 0.0, %s57_s4 }
 0x10d   :  { %60 = sst [smem:[#allocation7]] %s58_s5 }
 0x10e   :  { %136 = shalt.err (!%p133_p4)
}
 0x10f   :  { %s145_s13 = smov [#allocation7]  }
 0x110   :  { %68 = dma.smem_to_hbm %s145_s13, 16, %s199_s2, [#allocation4]  }
 0x111   :  { %141 = dma.done.wait [#allocation4], 16  }
 0x112   :  { %142 = vsyncadd [#allocation4], 4294967280 }
 0x113   :  { %72 = sfence }
 0x114   :  { %73 = vsyncpa [#allocation3], 1 }
 0x115   :  { %74 = vsyncpa [#allocation6], 1 }
 0x116   :  { %75 = vsyncpa [#allocation4], 1 }

</bundles_post_ra>
